<compile_context>
chip_gen: v7x
topology: tpu7x:2x2x1
jax: 0.10.0
libtpu: 0.0.40
codegen_flags: <defaults>
</compile_context>

<pallas_src>
import math

import jax
import jax.numpy as jnp
from jax.experimental import pallas as pl
from jax.experimental.pallas import tpu as pltpu


# ----------------------------------------------------------------------------
# Kernels
# ----------------------------------------------------------------------------

def _planar_flow_rowdot_kernel(b_sm, z_ref, w_ref, u_ref, o_ref):
    """Plain layout: one logical row per physical row, block = (TB, D)."""
    z = z_ref[...].astype(jnp.float32)                 # (TB, D)
    w = w_ref[...].astype(jnp.float32)                 # (1, D)
    u = u_ref[...].astype(jnp.float32)                 # (1, D)
    b = b_sm[0]                                        # f32 scalar (SMEM)

    # F.linear(z, w, b): row-wise dot against the single weight row (f32 acc).
    lin = jnp.sum(z * w, axis=-1, keepdims=True) + b   # (TB, 1)
    o_ref[...] = (z + u * jnp.tanh(lin)).astype(o_ref.dtype)


def _planar_flow_packed_kernel(b_sm, z_ref, wseg_ref, useg_ref, o_ref):
    """Lane-dense layout: k = P // D logical rows packed per physical row.

    z_ref:    (TB, P)  with P = k * D (multiple of 128)
    wseg_ref: (P, k)   column j holds w on rows  [j*D, (j+1)*D), zeros elsewhere
    useg_ref: (k, P)   row    j holds u on cols  [j*D, (j+1)*D), zeros elsewhere
    """
    z = z_ref[...].astype(jnp.float32)                 # (TB, P)
    b = b_sm[0]                                        # f32 scalar (SMEM)

    # Segmented row-dot: lin[r, j] = <z[r, j*D:(j+1)*D], w> + b
    lin = jnp.dot(z, wseg_ref[...],
                  preferred_element_type=jnp.float32) + b            # (TB, k)
    # Segmented broadcast-multiply: upd[r, j*D + d] = tanh(lin[r, j]) * u[d]
    upd = jnp.dot(jnp.tanh(lin), useg_ref[...],
                  preferred_element_type=jnp.float32)                 # (TB, P)
    o_ref[...] = (z + upd).astype(o_ref.dtype)


# ----------------------------------------------------------------------------
# Wrapper helpers
# ----------------------------------------------------------------------------

def _vmem_capacity_bytes():
    """Per-core VMEM capacity; conservative (v7x) default if query fails."""
    try:
        return int(pltpu.get_tpu_info().vmem_capacity_bytes)
    except Exception:
        return 64 << 20


def _vmem_limit_bytes(tile_bytes, vmem_cap):
    """Scoped-VMEM limit covering in/out double-buffering + small residents."""
    limit = 4 * int(tile_bytes) + (8 << 20)
    limit = max(limit, 32 << 20)
    limit = min(limit, (int(vmem_cap) * 3) // 4)
    return int(limit)


def _choose_packed_width(B, D, max_p=512):
    """Largest P = m * lcm(D, 128) <= max_p with (B*D) % P == 0 and P//D >= 2."""
    base = (D * 128) // math.gcd(D, 128)               # lcm(D, 128)
    if base > max_p:
        return None
    best = 0
    m = 1
    while base * m <= max_p:
        cand = base * m
        if (B * D) % cand == 0:
            best = cand
        m += 1
    if best == 0 or best // D < 2:                     # no packing / already lane-dense
        return None
    return best


def _pick_tile_rows(total_rows, row_bytes, itemsize, tile_budget_bytes,
                    min_grid=8):
    """Row-tile sized to the VMEM budget, sublane-aligned for the dtype,
    capped so big inputs give >= min_grid steps (v7x megacore), and nudged
    onto an even divisor of total_rows when that costs < 2x tile shrink."""
    sub = max(8, 32 // max(int(itemsize), 1))          # 8 f32, 16 bf16, 32 int8
    budget_rows = max(int(tile_budget_bytes) // max(int(row_bytes), 1), sub)
    cap_rows = max(sub, -(-int(total_rows) // int(min_grid)))   # ceil div
    tb = min(budget_rows, cap_rows)
    tb = (tb // sub) * sub
    if tb < sub:
        tb = sub
    if tb >= total_rows:
        return int(total_rows)                         # single full block
    t = tb
    floor_t = max(sub, tb // 2)
    while t >= floor_t:                                # prefer unmasked last block
        if total_rows % t == 0:
            return int(t)
        t -= sub
    return int(tb)


# ----------------------------------------------------------------------------
# Wrapper
# ----------------------------------------------------------------------------

def planar_flow(z, weight, bias, u, *, tile_budget_bytes=None):
    """Planar flow forward: z + u * tanh(z @ w.T + b).

    z: (B, D); weight, u: (1, D); bias: (1,).  Returns (B, D).
    """
    B, D = z.shape
    dtype = z.dtype
    itemsize = jnp.dtype(dtype).itemsize
    bias_sm = bias.reshape(1).astype(jnp.float32)      # f32 scalar -> SMEM

    vmem_cap = _vmem_capacity_bytes()
    if tile_budget_bytes is None:
        # 4x (in + out double-buffered) must fit comfortably under the scoped
        # limit; 8 MiB tiles on v7x (64 MiB VMEM), 16 MiB on v5e/v6e (128 MiB).
        tile_budget_bytes = min(vmem_cap // 8, 16 << 20)

    P = _choose_packed_width(B, D)
    if P is not None:
        # ---------------- lane-dense packed path ----------------
        k = P // D
        Bp = (B * D) // P
        z2 = z.reshape(Bp, P)                          # free row-major regroup
        eye = jnp.eye(k, dtype=jnp.float32)
        wseg = jnp.kron(eye, weight.reshape(D, 1).astype(jnp.float32))  # (P, k)
        useg = jnp.kron(eye, u.reshape(1, D).astype(jnp.float32))       # (k, P)

        tb = _pick_tile_rows(Bp, P * itemsize, itemsize, tile_budget_bytes)
        grid = (pl.cdiv(Bp, tb),)
        compiler_params = pltpu.CompilerParams(
            dimension_semantics=("parallel",),
            vmem_limit_bytes=_vmem_limit_bytes(tb * P * itemsize, vmem_cap),
        )
        # NOTE: if xprof shows exposed input DMA, `pipeline_mode=pl.Buffered(3)`
        # on the z BlockSpec is the next knob to sweep (costs +1 tile of VMEM).
        out = pl.pallas_call(
            _planar_flow_packed_kernel,
            out_shape=jax.ShapeDtypeStruct((Bp, P), dtype),
            grid_spec=pltpu.PrefetchScalarGridSpec(
                num_scalar_prefetch=1,                 # bias -> SMEM (f32)
                grid=grid,
                in_specs=[
                    pl.BlockSpec((tb, P), lambda i, b: (i, 0)),  # z tiles
                    pl.BlockSpec((P, k), lambda i, b: (0, 0)),   # wseg (resident)
                    pl.BlockSpec((k, P), lambda i, b: (0, 0)),   # useg (resident)
                ],
                out_specs=pl.BlockSpec((tb, P), lambda i, b: (i, 0)),
            ),
            compiler_params=compiler_params,
        )(bias_sm, z2, wseg, useg)
        return out.reshape(B, D)

    # ---------------- fallback: one logical row per physical row ----------------
    # TODO(synk): when packing is impossible (lcm(D,128) > 512 or B*D not a
    # multiple of it) and D is not itself a multiple of 128, stores are
    # lane-masked; pad D upstream for full HBM bandwidth.
    tb = _pick_tile_rows(B, D * itemsize, itemsize, tile_budget_bytes)
    grid = (pl.cdiv(B, tb),)
    compiler_params = pltpu.CompilerParams(
        dimension_semantics=("parallel",),
        vmem_limit_bytes=_vmem_limit_bytes(tb * D * itemsize, vmem_cap),
    )
    return pl.pallas_call(
        _planar_flow_rowdot_kernel,
        out_shape=jax.ShapeDtypeStruct((B, D), dtype),
        grid_spec=pltpu.PrefetchScalarGridSpec(
            num_scalar_prefetch=1,                     # bias -> SMEM (f32)
            grid=grid,
            in_specs=[
                pl.BlockSpec((tb, D), lambda i, b: (i, 0)),      # z tiles
                pl.BlockSpec((1, D), lambda i, b: (0, 0)),       # weight (resident)
                pl.BlockSpec((1, D), lambda i, b: (0, 0)),       # u (resident)
            ],
            out_specs=pl.BlockSpec((tb, D), lambda i, b: (i, 0)),
        ),
        compiler_params=compiler_params,
    )(bias_sm, z, weight, u)


def planar_flow_ref(z, weight, bias, u):
    zf = z.astype(jnp.float32)
    lin = jnp.sum(zf * weight.astype(jnp.float32), axis=-1, keepdims=True) \
        + bias.astype(jnp.float32)
    return zf + u.astype(jnp.float32) * jnp.tanh(lin)


if __name__ == "__main__":
    key = jax.random.PRNGKey(0)
    k_z, k_w, k_b, k_u, k_z2, k_z3, k_z4, k_z5 = jax.random.split(key, 8)

    # --- case 1: packed path (D=32 -> P=256), single tile ---
    B, D = 8, 32
    weight = jax.random.uniform(k_w, (1, D), jnp.float32, -0.01, 0.01)
    bias = jax.random.uniform(k_b, (1,), jnp.float32, -0.01, 0.01)
    u = jax.random.uniform(k_u, (1, D), jnp.float32, -0.01, 0.01)
    z = jax.random.normal(k_z, (B, D), jnp.float32)

    out = jax.block_until_ready(planar_flow(z, weight, bias, u))
    ref = planar_flow_ref(z, weight, bias, u)
    assert out.shape == (B, D)
    assert jnp.allclose(out, ref, atol=1e-5, rtol=1e-5), "packed path mismatch"

    # --- case 2: packed path with a multi-tile grid (exercises pipelining) ---
    B3, D3 = 512, 32
    z3 = jax.random.normal(k_z3, (B3, D3), jnp.float32)
    out3 = jax.block_until_ready(
        planar_flow(z3, weight, bias, u, tile_budget_bytes=8192))
    ref3 = planar_flow_ref(z3, weight, bias, u)
    assert out3.shape == (B3, D3)
    assert jnp.allclose(out3, ref3, atol=1e-5, rtol=1e-5), "tiled packed mismatch"

    # --- case 3: D=48 now takes the packed path (P = lcm(48,128) = 384) ---
    B2, D2 = 64, 48
    w2 = jax.random.uniform(k_w, (1, D2), jnp.float32, -0.01, 0.01)
    b2 = jax.random.uniform(k_b, (1,), jnp.float32, -0.01, 0.01)
    u2 = jax.random.uniform(k_u, (1, D2), jnp.float32, -0.01, 0.01)
    z2 = jax.random.normal(k_z2, (B2, D2), jnp.float32)
    out2 = jax.block_until_ready(planar_flow(z2, w2, b2, u2))
    ref2 = planar_flow_ref(z2, w2, b2, u2)
    assert out2.shape == (B2, D2)
    assert jnp.allclose(out2, ref2, atol=1e-5, rtol=1e-5), "D=48 packed mismatch"

    # --- case 4: genuine fallback (B*D not a multiple of lcm(D,128)) ---
    B4, D4 = 10, 48
    z4 = jax.random.normal(k_z4, (B4, D4), jnp.float32)
    out4 = jax.block_until_ready(planar_flow(z4, w2, b2, u2))
    ref4 = planar_flow_ref(z4, w2, b2, u2)
    assert out4.shape == (B4, D4)
    assert jnp.allclose(out4, ref4, atol=1e-5, rtol=1e-5), "fallback mismatch"

    # --- case 5: bf16 input (f32 SMEM bias + f32 accumulation path) ---
    B5, D5 = 64, 32
    z5 = jax.random.normal(k_z5, (B5, D5), jnp.float32).astype(jnp.bfloat16)
    out5 = jax.block_until_ready(planar_flow(z5, weight, bias, u))
    ref5 = planar_flow_ref(z5, weight, bias, u)
    assert out5.shape == (B5, D5)
    assert jnp.allclose(out5.astype(jnp.float32), ref5, atol=5e-2, rtol=5e-2), \
        "bf16 packed mismatch"

    print("KERNEL_OK")
</pallas_src>

<mosaic_0001>
module attributes {stable_mosaic.version = 11 : i64} {
  func.func @_planar_flow_packed_kernel(%arg0: i32, %arg1: memref<1xf32, #tpu.memory_space<smem>>, %arg2: memref<1x256xf32, #tpu.memory_space<vmem>>, %arg3: memref<256x8xf32, #tpu.memory_space<vmem>>, %arg4: memref<8x256xf32, #tpu.memory_space<vmem>>, %arg5: memref<1x256xf32, #tpu.memory_space<vmem>>) attributes {dimension_semantics = [#tpu.dimension_semantics<parallel>], iteration_bounds = array<i64: 1>, scalar_prefetch = 1 : i64, scratch_operands = 0 : i64, tpu.core_type = #tpu.core_type<tc>, window_params = [{transform_indices = @transform_0, window_bounds = array<i64: 1, 256>}, {pipeline_mode = #tpu.pipeline_mode<synchronous>, transform_indices = @transform_1, window_bounds = array<i64: 256, 8>}, {pipeline_mode = #tpu.pipeline_mode<synchronous>, transform_indices = @transform_2, window_bounds = array<i64: 8, 256>}, {transform_indices = @transform_3, window_bounds = array<i64: 1, 256>}]} {
    %c0 = arith.constant 0 : index
    %c0_0 = arith.constant 0 : index
    %0 = vector.load %arg2[%c0, %c0_0] : memref<1x256xf32, #tpu.memory_space<vmem>>, vector<1x256xf32>
    %c0_1 = arith.constant 0 : index
    %1 = memref.load %arg1[%c0_1] : memref<1xf32, #tpu.memory_space<smem>>
    %c0_2 = arith.constant 0 : index
    %c0_3 = arith.constant 0 : index
    %2 = vector.load %arg3[%c0_2, %c0_3] : memref<256x8xf32, #tpu.memory_space<vmem>>, vector<256x8xf32>
    %cst = arith.constant dense<0.000000e+00> : vector<1x8xf32>
    %3 = tpu.matmul %0, %2, %cst {dimension_numbers = #tpu.dot_dimension_numbers<[1], [0], [0], [1], [0, 0, 1, 1], [], []>} : vector<1x256xf32>, vector<256x8xf32>, vector<1x8xf32> -> vector<1x8xf32>
    %4 = vector.broadcast %1 : f32 to vector<1x8xf32>
    %5 = arith.addf %3, %4 : vector<1x8xf32>
    %6 = math.tanh %5 : vector<1x8xf32>
    %c0_4 = arith.constant 0 : index
    %c0_5 = arith.constant 0 : index
    %7 = vector.load %arg4[%c0_4, %c0_5] : memref<8x256xf32, #tpu.memory_space<vmem>>, vector<8x256xf32>
    %cst_6 = arith.constant dense<0.000000e+00> : vector<1x256xf32>
    %8 = tpu.matmul %6, %7, %cst_6 {dimension_numbers = #tpu.dot_dimension_numbers<[1], [0], [0], [1], [0, 0, 1, 1], [], []>} : vector<1x8xf32>, vector<8x256xf32>, vector<1x256xf32> -> vector<1x256xf32>
    %9 = arith.addf %0, %8 : vector<1x256xf32>
    %c0_7 = arith.constant 0 : index
    %c0_8 = arith.constant 0 : index
    %10 = vector.load %arg5[%c0_7, %c0_8] : memref<1x256xf32, #tpu.memory_space<vmem>>, vector<1x256xf32>
    tpu.vector_store %arg5[%c0_7, %c0_8], %9 {strides = array<i32>} : memref<1x256xf32, #tpu.memory_space<vmem>>, vector<1x256xf32>,
    return
  }
  func.func @transform_0(%arg0: i32, %arg1: memref<1xf32, #tpu.memory_space<smem>>) -> (i32, i32) {
    %c0_i32 = arith.constant 0 : i32
    %c0_i32_0 = arith.constant 0 : i32
    return %arg0, %c0_i32 : i32, i32
  }
  func.func @transform_1(%arg0: i32, %arg1: memref<1xf32, #tpu.memory_space<smem>>) -> (i32, i32) {
    %c0_i32 = arith.constant 0 : i32
    %c0_i32_0 = arith.constant 0 : i32
    %c0_i32_1 = arith.constant 0 : i32
    return %c0_i32, %c0_i32_0 : i32, i32
  }
  func.func @transform_2(%arg0: i32, %arg1: memref<1xf32, #tpu.memory_space<smem>>) -> (i32, i32) {
    %c0_i32 = arith.constant 0 : i32
    %c0_i32_0 = arith.constant 0 : i32
    %c0_i32_1 = arith.constant 0 : i32
    return %c0_i32, %c0_i32_0 : i32, i32
  }
  func.func @transform_3(%arg0: i32, %arg1: memref<1xf32, #tpu.memory_space<smem>>) -> (i32, i32) {
    %c0_i32 = arith.constant 0 : i32
    %c0_i32_0 = arith.constant 0 : i32
    return %arg0, %c0_i32 : i32, i32
  }
}

</mosaic_0001>

<bundles_post_ra>
// kernel: tpu_custom_call.1
= control target key start
LH: loop header
LB: loop body
LE: loop exit
PB: predicated region body
PF: predicated region fallthrough
CT: control target
= control target key end

     0   :  { %v53_v3 = vlaneseq  ;;  %s506_s0 = inlined_call_operand.<no memory space> [shape: f32[1], index: 0, kind: input, shape index: {}]   ;;  %s507_s1 = inlined_call_operand.vmem [shape: f32[1,256], index: 1, kind: input, shape index: {}]   ;;  %s508_s2 = inlined_call_operand.vmem [shape: f32[256,8], index: 2, kind: input, shape index: {}]   ;;  %s509_s3 = inlined_call_operand.vmem [shape: f32[8,256], index: 3, kind: input, shape index: {}]   ;;  %s510_s4 = inlined_call_operand.hbm [shape: f32[1,256], index: 4, kind: output, shape index: {}]  }
   0x1   :  { %v35_v0 = vld [vmem:[%s508_s2 + $0x80] sm:$0xff]  ;;  %v36_v1 = vld [vmem:[%s508_s2 + $0x88] sm:$0xff]  ;;  %v37_v6 = vld [vmem:[%s508_s2 + $0x90] sm:$0xff] }
   0x2   :  { %v19_v2 = vld [vmem:[%s508_s2] sm:$0xff]  ;;  %v285_v4 = vpack.c.bf16 %v36_v1, %v35_v0  ;;  %v20_v5 = vld [vmem:[%s508_s2 + $0x8] sm:$0xff]  ;;  %v38_v7 = vld [vmem:[%s508_s2 + $0x98] sm:$0xff]  ;;  %v405_v14 = vshrl.u32 %v53_v3, 7 }
   0x3   :  { %v287_v8 = vpack.c.bf16 %v20_v5, %v19_v2  ;;  %v289_v9 = vpack.c.bf16 %v38_v7, %v37_v6  ;;  %v21_v10 = vld [vmem:[%s508_s2 + $0x10] sm:$0xff]  ;;  %v22_v11 = vld [vmem:[%s508_s2 + $0x18] sm:$0xff]  ;;  %v39_v12 = vld [vmem:[%s508_s2 + $0xa0] sm:$0xff] }
   0x4   :  { %286 = vmatprep.subr.bf16.mxu0 %v285_v4  ;;  %v40_v13 = vld [vmem:[%s508_s2 + $0xa8] sm:$0xff]  ;;  %v291_v15 = vpack.c.bf16 %v22_v11, %v21_v10  ;;  %v23_v17 = vld [vmem:[%s508_s2 + $0x20] sm:$0xff]  ;;  %v41_v19 = vld [vmem:[%s508_s2 + $0xb0] sm:$0xff]  ;;  %v59_v21 = vsub.s32 1, %v405_v14 }
   0x5   :  { %288 = vmatpush3.bf16.msra.mxu0 %v287_v8  ;;  %v293_v16 = vpack.c.bf16 %v40_v13, %v39_v12  ;;  %v24_v18 = vld [vmem:[%s508_s2 + $0x28] sm:$0xff]  ;;  %v42_v20 = vld [vmem:[%s508_s2 + $0xb8] sm:$0xff]  ;;  %v25_v24 = vld [vmem:[%s508_s2 + $0x30] sm:$0xff] }
   0x6   :  { %290 = vmatprep.subr.bf16.mxu0 %v289_v9  ;;  %v295_v22 = vpack.c.bf16 %v24_v18, %v23_v17  ;;  %v297_v23 = vpack.c.bf16 %v42_v20, %v41_v19  ;;  %v26_v25 = vld [vmem:[%s508_s2 + $0x38] sm:$0xff]  ;;  %v43_v26 = vld [vmem:[%s508_s2 + $0xc0] sm:$0xff]  ;;  %v44_v27 = vld [vmem:[%s508_s2 + $0xc8] sm:$0xff] }
   0x7   :  { %v435_v28 = vld [vmem:[%s507_s1] sm:$0x3] }
   0x8   :  { %v60_v29 = vrot.slane %v435_v28, %v59_v21 }
   0x9   :  { %292 = vmatpush3.bf16.msra.mxu0 %v291_v15 }
   0xa   :  { %294 = vmatprep.subr.bf16.mxu0 %v293_v16 }
   0xb   :  { %10 = vsyncpa [#allocation5], 0  ;;  %v299_v30 = vpack.c.bf16 %v26_v25, %v25_v24  ;;  %v301_v31 = vpack.c.bf16 %v44_v27, %v43_v26  ;;  %v27_v32 = vld [vmem:[%s508_s2 + $0x40] sm:$0xff]  ;;  %v28_v33 = vld [vmem:[%s508_s2 + $0x48] sm:$0xff]  ;;  %127 = vmatprep.mubr.f32.mxu0 %v60_v29  ;;  %v55_v52 = vsub.s32 0, %v405_v14  ;;  %v346_v57 = vmov 0.0  }
   0xc   :  { %v45_v34 = vld [vmem:[%s508_s2 + $0xd0] sm:$0xff]  ;;  %v46_v35 = vld [vmem:[%s508_s2 + $0xd8] sm:$0xff]  ;;  %v303_v36 = vpack.c.bf16 %v28_v33, %v27_v32  ;;  %v47_v40 = vld [vmem:[%s508_s2 + $0xe0] sm:$0xff]  ;;  %204 = vmatprep.mubr.f32.mxu1 %v346_v57  ;;  %v51_v59 = vstv %s506_s0  ;;  %vm136_vm0 = vcmask 64512   ;;  %v347_v0 = vmov 1966171168  }
   0xd   :  { %296 = vmatpush3.bf16.msra.mxu0 %v295_v22  ;;  %v305_v37 = vpack.c.bf16 %v46_v35, %v45_v34  ;;  %v29_v38 = vld [vmem:[%s508_s2 + $0x50] sm:$0xff]  ;;  %v30_v39 = vld [vmem:[%s508_s2 + $0x58] sm:$0xff]  ;;  %v48_v41 = vld [vmem:[%s508_s2 + $0xe8] sm:$0xff]  ;;  %v56_v54 = vrot.slane %v435_v28, %v55_v52  ;;  %v215_v1 = vunpack.c.l.s4 %v347_v0  ;;  %vm232_vm1 = vcmp.lt.s32.totalorder %v53_v3, 256 }
   0xe   :  { %298 = vmatprep.subr.bf16.mxu0 %v297_v23  ;;  %v307_v42 = vpack.c.bf16 %v30_v39, %v29_v38  ;;  %v309_v43 = vpack.c.bf16 %v48_v41, %v47_v40  ;;  %v31_v44 = vld [vmem:[%s508_s2 + $0x60] sm:$0xff]  ;;  %v32_v45 = vld [vmem:[%s508_s2 + $0x68] sm:$0xff]  ;;  %v49_v46 = vld [vmem:[%s508_s2 + $0xf0] sm:$0xff] }
   0xf   :  { %v50_v47 = vld [vmem:[%s508_s2 + $0xf8] sm:$0xff]  ;;  %v311_v48 = vpack.c.bf16 %v32_v45, %v31_v44  ;;  %v33_v50 = vld [vmem:[%s508_s2 + $0x70] sm:$0xff]  ;;  %v135_v55 = vld [vmem:[%s509_s3 + $0x8] sm:$0xff]  ;;  %v216_v2 = vunpack.c.0.s8 %v215_v1 }
  0x10   :  { %v313_v49 = vpack.c.bf16 %v50_v47, %v49_v46  ;;  %v34_v51 = vld [vmem:[%s508_s2 + $0x78] sm:$0xff]  ;;  %v134_v56 = vld [vmem:[%s509_s3] sm:$0xff]  ;;  %140 = vmatprep.subr.mxu1 %v135_v55  ;;  %s348_s3 = smov [#allocation4]  }
  0x11   :  { %300 = vmatpush3.bf16.msra.mxu0 %v299_v30  ;;  %v315_v53 = vpack.c.bf16 %v34_v51, %v33_v50  ;;  %141 = vmatpush1.msra.mxu1 %v134_v56  ;;  %v219_v5 = vsub.s32 %v216_v2, %v405_v14  ;;  %s241_s1 = sshll.u32 %s348_s3, 4  ;;  %s242_s1 = int_to_ptr.vmem [resolvable:$true] %s241_s1 }
  0x12   :  { %302 = vmatprep.subr.bf16.mxu0 %v301_v31  ;;  %s322_s0 = scalar_lea.vmem %s242_s1, 32  ;;  %p327_p1 = scmp.lt.s32.totalorder %s242_s1, %s242_s1 }
  0x13   :  { %p323_p0 = scmp.ne.s32.totalorder %s242_s1, %s322_s0  ;;  %p328_p2 = scmp.lt.s32.totalorder %s322_s0, %s322_s0 }
  0x15   :  { %304 = vmatpush3.bf16.msra.mxu0 %v303_v36  ;;  %p329_p3 = por %p328_p2, %p327_p1 }
  0x16   :  { %306 = vmatprep.subr.bf16.mxu0 %v305_v37 }
  0x17   :  { %p330_p4 = pnand %p329_p3, %p323_p0 }
  0x19   :  { %308 = vmatpush3.bf16.msra.mxu0 %v307_v42 }
  0x1a   :  { %310 = vmatprep.subr.bf16.mxu0 %v309_v43 }
  0x1d   :  { %312 = vmatpush3.bf16.msra.mxu0 %v311_v48 }
  0x1e   :  { %314 = vmatprep.subr.bf16.mxu0 %v313_v49 }
  0x21   :  { %316 = vmatpush3.bf16.msra.mxu0 %v315_v53 }
  0x24   :  { %128 = vmatmul.mubr.f32.vlgmr.msra.gmra.mrb[0].mxu0 %v56_v54 }
  0xf7   :  { %v282_v58 = vpop.f32.mrb[0].mxu0 }
  0xf8   :  { %v283_v60 = vpop.f32.mrb[1].mxu0 }
  0xf9   :  { %v284_v61 = vadd.f32 %v283_v60, %v282_v58 }
  0xfb   :  { %v130_v62 = vadd.f32 %v284_v61, %v51_v59 }
  0xfd   :  { %320 = vtanh.f32 %v130_v62 }
 0x107   :  { %v321_v63 = vpop.eup %320 }
 0x108   :  { %249 = vmatmul.mubr.msk.f32.vlgmr.msra.gmra.mrb[0].mxu1 %vm136_vm0, %v321_v63 }
 0x1db   :  { %v206_v4 = vpop.f32.mrb[0].mxu1 }
 0x1dc   :  { %v208_v6 = vpop.f32.mrb[1].mxu1 }
 0x1dd   :  { %v213_v7 = vcombine.low %v206_v4, %v208_v6 }
 0x1df   :  { %v220_v8 = vrot.slane %v213_v7, %v219_v5 }
 0x1e1   :  { %v227_v9 = vrot.slane %v220_v8, %v219_v5 }
 0x1e3   :  { %v229_v10 = vadd.f32 %v227_v9, %v435_v28 }
 0x1e5   :  { %234 = vst.msk [vmem:[#allocation4] sm:$0x3] %vm232_vm1, %v229_v10 }
 0x1e6   :  { %333 = shalt.err (!%p330_p4)
}
 0x1e7   :  { %s334_s9 = scalar_lea.hbm %s510_s4, 32 }
 0x1e8   :  { %p335_p5 = scmp.ne.s32.totalorder %s510_s4, %s334_s9  ;;  %p338_p6 = scmp.lt.u32.totalorder %s334_s9, %s510_s4 }
 0x1ea   :  { %p340_p7 = pnand %p338_p6, %p335_p5 }
 0x1ec   :  { %343 = shalt.err (!%p340_p7)
}
 0x1ed   :  { %244 = dma.vmem_to_hbm [thread:$0]  %s242_s1, 32, %s510_s4, [#allocation5]  }
 0x1ee   :  { %344 = dma.done.wait [#allocation5], 32  }
 0x1ef   :  { %345 = vsyncadd [#allocation5], 4294967264 }
 0x1f0   :  { %248 = vsyncpa [#allocation5], 1 }

</bundles_post_ra>
